<compile_context>
chip_gen: v5e
topology: v5e:2x2
jax: 0.10.0
libtpu: 0.0.40
codegen_flags: <defaults>
</compile_context>

<pallas_src>
import functools

import jax
import jax.numpy as jnp
from jax.experimental import pallas as pl
from jax.experimental.pallas import tpu as pltpu


def _make_kernel(num_k_steps):
    """Kernel specialized on the static number of K (reduction) grid steps."""

    def kernel(mean_ref, a_ref, b_ref, o_ref):
        # TODO(synk): the real module calls a Mithral LUT-based approximate
        # matmul (mithral_wrapped uint8 codebook/LUT kernel); that path has no
        # clean Pallas equivalent, so the exact matmul it approximates runs on
        # the MXU instead.
        partial = jnp.dot(a_ref[...], b_ref[...],
                          preferred_element_type=jnp.float32)

        if num_k_steps == 1:
            # Shipped case (grid collapses to a single K step): one fused
            # store -- no zero-init, no accumulate pass, no re-load for scale.
            o_ref[...] = partial * mean_ref[0, 0]
        else:
            k = pl.program_id(2)

            @pl.when(k == 0)
            def _():
                o_ref[...] = partial                       # no zero-init pass

            @pl.when(jnp.logical_and(k > 0, k < num_k_steps - 1))
            def _():
                o_ref[...] += partial

            @pl.when(k == num_k_steps - 1)
            def _():
                # Fold final accumulate + mean(X) scale into one output pass
                # (matters most on v5e with its single vector-store slot).
                o_ref[...] = (o_ref[...] + partial) * mean_ref[0, 0]

    return kernel


def _round_up(x, m):
    return ((x + m - 1) // m) * m


def _pick_tile(dim, cap, align):
    """(8,128)/MXU-aligned tile, capped so double-buffered tiles stay small."""
    return min(_round_up(dim, align), cap)


@functools.partial(jax.jit, static_argnames=("input_dtype",))
def mithral_nn_forward(X, X_test, W_test, *, input_dtype=jnp.float32):
    N, D = X_test.shape
    D2, M = W_test.shape
    assert D == D2

    # np.mean(X): computed on the true (unpadded) element count; handed to the
    # kernel as a (1,1) SMEM scalar.  allow_input_fusion (below) lets XLA fold
    # this producer into the pallas_call input rather than a separate kernel.
    mean_x = jnp.mean(X.astype(jnp.float32)).reshape(1, 1)

    # Tile sizes: MXU-friendly (always multiples of 128 in the lane dims, so
    # v5e's 128-wide MXU is natively covered) and capped so the pipeline's
    # double-buffered f32 tiles stay ~2 MiB -- inside the default scoped VMEM
    # and v7x's 64 MiB physical VMEM regardless of the input shape.
    tm = _pick_tile(N, 256, 8)
    tn = _pick_tile(M, 256, 128)
    tk = _pick_tile(D, 512, 128)

    # Zero-pad non-divisible shapes up to the tile grid (K padding is exact
    # for the matmul; padded output rows/cols are sliced off below).  At the
    # shipped 32x256x128 shape this is a no-op and the grid is (1, 1, 1).
    Np, Mp, Dp = _round_up(N, tm), _round_up(M, tn), _round_up(D, tk)
    a = X_test.astype(input_dtype)
    b = W_test.astype(input_dtype)
    if (Np, Dp) != (N, D):
        a = jnp.pad(a, ((0, Np - N), (0, Dp - D)))
    if (Dp, Mp) != (D, M):
        b = jnp.pad(b, ((0, Dp - D), (0, Mp - M)))

    grid = (Np // tm, Mp // tn, Dp // tk)

    out = pl.pallas_call(
        _make_kernel(grid[2]),
        out_shape=jax.ShapeDtypeStruct((Np, Mp), jnp.float32),
        grid_spec=pltpu.PrefetchScalarGridSpec(
            num_scalar_prefetch=0,
            grid=grid,
            in_specs=[
                # (1,1) scalar mean lives in SMEM; whole array, no tiling.
                pl.BlockSpec(memory_space=pltpu.MemorySpace.SMEM),
                pl.BlockSpec((tm, tk), lambda i, j, k: (i, k)),   # X_test tile
                pl.BlockSpec((tk, tn), lambda i, j, k: (k, j)),   # W_test tile
            ],
            out_specs=pl.BlockSpec((tm, tn), lambda i, j, k: (i, j)),
        ),
        compiler_params=pltpu.CompilerParams(
            # Output axes parallel (v7x megacore has work to split whenever
            # the deployed N or M yields >=2 blocks); K reduction last.
            dimension_semantics=("parallel", "parallel", "arbitrary"),
            # Allow XLA to fuse the mean(X) producer into operand 0.
            allow_input_fusion=[True, False, False],
            vmem_limit_bytes=32 * 1024 * 1024,
        ),
    )(mean_x, a, b)

    if (Np, Mp) != (N, M):
        out = out[:N, :M]
    return out


if __name__ == "__main__":
    key = jax.random.PRNGKey(0)
    k_x, k_xtest, k_wtest = jax.random.split(key, 3)

    # align32: number of X_test rows is a multiple of 32 (as in the reference).
    N, D, M = 32, 256, 128          # X_test: (N, D), W_test: (D, M)
    ncodebooks, lutconsts = 4, -1   # hyperparams of the (replaced) Mithral task

    # Deterministic in-script "parameters" of the task / module.
    X_test = jax.random.normal(k_xtest, (N, D), dtype=jnp.float32)
    W_test = jax.random.normal(k_wtest, (D, M), dtype=jnp.float32)
    _W = jnp.arange(10, dtype=jnp.int32)   # unused nn.Parameter in the module

    # Forward-pass input X (only its global mean is used).
    X = jax.random.normal(k_x, (2, 4, 16, 16), dtype=jnp.float32)

    out = jax.block_until_ready(mithral_nn_forward(X, X_test, W_test))

    # Reference: exact semantics of forward() with an exact matmul.
    ref = (X_test @ W_test) * jnp.mean(X)
    assert out.shape == (N, M)
    assert jnp.allclose(out, ref, rtol=1e-5, atol=1e-5)

    print("KERNEL_OK")
</pallas_src>

<mosaic_0001>
module attributes {stable_mosaic.version = 11 : i64} {
  func.func @kernel(%arg0: i32, %arg1: i32, %arg2: i32, %arg3: memref<1x1xf32, #tpu.memory_space<smem>>, %arg4: memref<32x256xf32, #tpu.memory_space<vmem>>, %arg5: memref<256x128xf32, #tpu.memory_space<vmem>>, %arg6: memref<32x128xf32, #tpu.memory_space<vmem>>) attributes {dimension_semantics = [#tpu.dimension_semantics<parallel>, #tpu.dimension_semantics<parallel>, #tpu.dimension_semantics<arbitrary>], iteration_bounds = array<i64: 1, 1, 1>, scalar_prefetch = 0 : i64, scratch_operands = 0 : i64, tpu.core_type = #tpu.core_type<tc>, window_params = [{transform_indices = @transform_0, window_bounds = array<i64: 1, 1>}, {transform_indices = @transform_1, window_bounds = array<i64: 32, 256>}, {transform_indices = @transform_2, window_bounds = array<i64: 256, 128>}, {transform_indices = @transform_3, window_bounds = array<i64: 32, 128>}]} {
    %c0 = arith.constant 0 : index
    %c0_0 = arith.constant 0 : index
    %0 = vector.load %arg4[%c0, %c0_0] : memref<32x256xf32, #tpu.memory_space<vmem>>, vector<32x256xf32>
    %c0_1 = arith.constant 0 : index
    %c0_2 = arith.constant 0 : index
    %1 = vector.load %arg5[%c0_1, %c0_2] : memref<256x128xf32, #tpu.memory_space<vmem>>, vector<256x128xf32>
    %cst = arith.constant dense<0.000000e+00> : vector<32x128xf32>
    %2 = tpu.matmul %0, %1, %cst {dimension_numbers = #tpu.dot_dimension_numbers<[1], [0], [0], [1], [0, 0, 1, 1], [], []>} : vector<32x256xf32>, vector<256x128xf32>, vector<32x128xf32> -> vector<32x128xf32>
    %c0_3 = arith.constant 0 : index
    %c0_4 = arith.constant 0 : index
    %3 = memref.load %arg3[%c0_3, %c0_4] : memref<1x1xf32, #tpu.memory_space<smem>>
    %4 = vector.broadcast %3 : f32 to vector<32x128xf32>
    %5 = arith.mulf %2, %4 : vector<32x128xf32>
    %c0_5 = arith.constant 0 : index
    %c0_6 = arith.constant 0 : index
    %6 = vector.load %arg6[%c0_5, %c0_6] : memref<32x128xf32, #tpu.memory_space<vmem>>, vector<32x128xf32>
    tpu.vector_store %arg6[%c0_5, %c0_6], %5 {strides = array<i32>} : memref<32x128xf32, #tpu.memory_space<vmem>>, vector<32x128xf32>,
    return
  }
  func.func @transform_0(%arg0: i32, %arg1: i32, %arg2: i32) -> (i32, i32) {
    %c0_i32 = arith.constant 0 : i32
    %c0_i32_0 = arith.constant 0 : i32
    %c0_i32_1 = arith.constant 0 : i32
    return %c0_i32, %c0_i32_0 : i32, i32
  }
  func.func @transform_1(%arg0: i32, %arg1: i32, %arg2: i32) -> (i32, i32) {
    %c0_i32 = arith.constant 0 : i32
    return %arg0, %arg2 : i32, i32
  }
  func.func @transform_2(%arg0: i32, %arg1: i32, %arg2: i32) -> (i32, i32) {
    %c0_i32 = arith.constant 0 : i32
    return %arg2, %arg1 : i32, i32
  }
  func.func @transform_3(%arg0: i32, %arg1: i32, %arg2: i32) -> (i32, i32) {
    %c0_i32 = arith.constant 0 : i32
    return %arg0, %arg1 : i32, i32
  }
}

</mosaic_0001>

<bundles_post_ra>
// kernel: mithral_nn_forward.1
= control target key start
LH: loop header
LB: loop body
LE: loop exit
PB: predicated region body
PF: predicated region fallthrough
CT: control target
= control target key end

     0   :  { %9 = vsyncpa [#allocation4], 0  ;;  %s310_s0 = inlined_call_operand.<no memory space> [shape: f32[1,1], index: 0, kind: input, shape index: {}]   ;;  %s311_s1 = inlined_call_operand.vmem [shape: f32[32,256], index: 1, kind: input, shape index: {}]   ;;  %s312_s2 = inlined_call_operand.hbm [shape: f32[256,128], index: 2, kind: input, shape index: {}]   ;;  %s313_s3 = inlined_call_operand.hbm [shape: f32[32,128], index: 3, kind: output, shape index: {}]  }
   0x1   :  { %10 = vsyncpa [#allocation5], 0  ;;  %s19_s14 = sshll.u32 %s312_s2, 4  ;;  %s247_s15 = smov [#allocation3]   ;;  %s20_s14 = int_to_ptr.hbm [resolvable:$true] %s19_s14 }
   0x2   :  { %s21_s16 = sshll.u32 %s247_s15, 4  ;;  %s248_s17 = smov 128   ;;  %s22_s16 = int_to_ptr.vmem [resolvable:$true] %s21_s16 }
   0x3   :  { %s249_s18 = smov 8  }
   0x4   :  { %27 = dma.hbm_to_vmem [thread:$0]  %s20_s14, 4096, %s22_s16, [#allocation4], %s248_s17, %s248_s17, %s249_s18  }
   0x5   :  { %243 = dma.done.wait [#allocation4], 4096  }
   0x6   :  { %244 = vsyncadd [#allocation4], 4294963200  ;;  %v55_v0 = vld [vmem:[#allocation3 + $0x78] sm:$0xff]  ;;  %v54_v2 = vld [vmem:[#allocation3 + $0x70] sm:$0xff]  ;;  %v131_v42 = vstv %s310_s0  ;;  %s146_s0 = sshll.u32 %s313_s3, 4  ;;  %s147_s0 = int_to_ptr.hbm [resolvable:$true] %s146_s0 }
   0x7   :  { %v71_v1 = vld [vmem:[#allocation3 + $0xf8] sm:$0xff]  ;;  %159 = vmatpush.msra.mxu2 %v55_v0  ;;  %v70_v3 = vld [vmem:[#allocation3 + $0xf0] sm:$0xff]  ;;  %v53_v4 = vld [vmem:[#allocation3 + $0x68] sm:$0xff]  ;;  %72 = vmatpush.msra.mxu0 %v55_v0 }
   0x8   :  { %175 = vmatpush.msra.mxu3 %v71_v1  ;;  %v69_v5 = vld [vmem:[#allocation3 + $0xe8] sm:$0xff]  ;;  %101 = vmatpush.msra.mxu1 %v71_v1  ;;  %v52_v6 = vld [vmem:[#allocation3 + $0x60] sm:$0xff]  ;;  %v51_v8 = vld [vmem:[#allocation3 + $0x58] sm:$0xff] }
   0x9   :  { %160 = vmatpush.msra.mxu2 %v54_v2  ;;  %v68_v7 = vld [vmem:[#allocation3 + $0xe0] sm:$0xff]  ;;  %73 = vmatpush.msra.mxu0 %v54_v2  ;;  %v67_v9 = vld [vmem:[#allocation3 + $0xd8] sm:$0xff]  ;;  %v50_v10 = vld [vmem:[#allocation3 + $0x50] sm:$0xff] }
   0xa   :  { %176 = vmatpush.msra.mxu3 %v70_v3  ;;  %102 = vmatpush.msra.mxu1 %v70_v3  ;;  %v66_v11 = vld [vmem:[#allocation3 + $0xd0] sm:$0xff]  ;;  %v49_v12 = vld [vmem:[#allocation3 + $0x48] sm:$0xff]  ;;  %v48_v14 = vld [vmem:[#allocation3 + $0x40] sm:$0xff] }
   0xb   :  { %161 = vmatpush.msra.mxu2 %v53_v4  ;;  %74 = vmatpush.msra.mxu0 %v53_v4  ;;  %v65_v13 = vld [vmem:[#allocation3 + $0xc8] sm:$0xff]  ;;  %v64_v15 = vld [vmem:[#allocation3 + $0xc0] sm:$0xff]  ;;  %v47_v16 = vld [vmem:[#allocation3 + $0x38] sm:$0xff] }
   0xc   :  { %177 = vmatpush.msra.mxu3 %v69_v5  ;;  %103 = vmatpush.msra.mxu1 %v69_v5  ;;  %v63_v17 = vld [vmem:[#allocation3 + $0xb8] sm:$0xff]  ;;  %v46_v18 = vld [vmem:[#allocation3 + $0x30] sm:$0xff]  ;;  %v45_v20 = vld [vmem:[#allocation3 + $0x28] sm:$0xff] }
   0xd   :  { %162 = vmatpush.msra.mxu2 %v52_v6  ;;  %75 = vmatpush.msra.mxu0 %v52_v6  ;;  %v62_v19 = vld [vmem:[#allocation3 + $0xb0] sm:$0xff]  ;;  %v61_v21 = vld [vmem:[#allocation3 + $0xa8] sm:$0xff]  ;;  %v44_v22 = vld [vmem:[#allocation3 + $0x20] sm:$0xff] }
   0xe   :  { %178 = vmatpush.msra.mxu3 %v68_v7  ;;  %104 = vmatpush.msra.mxu1 %v68_v7  ;;  %v60_v23 = vld [vmem:[#allocation3 + $0xa0] sm:$0xff]  ;;  %v43_v24 = vld [vmem:[#allocation3 + $0x18] sm:$0xff]  ;;  %v42_v26 = vld [vmem:[#allocation3 + $0x10] sm:$0xff] }
   0xf   :  { %163 = vmatpush.msra.mxu2 %v51_v8  ;;  %76 = vmatpush.msra.mxu0 %v51_v8  ;;  %v59_v25 = vld [vmem:[#allocation3 + $0x98] sm:$0xff]  ;;  %v58_v27 = vld [vmem:[#allocation3 + $0x90] sm:$0xff]  ;;  %v41_v28 = vld [vmem:[#allocation3 + $0x8] sm:$0xff] }
  0x10   :  { %179 = vmatpush.msra.mxu3 %v67_v9  ;;  %105 = vmatpush.msra.mxu1 %v67_v9  ;;  %v57_v29 = vld [vmem:[#allocation3 + $0x88] sm:$0xff]  ;;  %v40_v30 = vld [vmem:[#allocation3] sm:$0xff]  ;;  %v38_v36 = vld [vmem:[%s311_s1 + $0x30] sm:$0xff] }
  0x11   :  { %164 = vmatpush.msra.mxu2 %v50_v10  ;;  %77 = vmatpush.msra.mxu0 %v50_v10  ;;  %v56_v31 = vld [vmem:[#allocation3 + $0x80] sm:$0xff]  ;;  %v37_v33 = vld [vmem:[%s311_s1 + $0x28] sm:$0xff]  ;;  %v39_v37 = vld [vmem:[%s311_s1 + $0x38] sm:$0xff] }
  0x12   :  { %180 = vmatpush.msra.mxu3 %v66_v11  ;;  %106 = vmatpush.msra.mxu1 %v66_v11  ;;  %v36_v32 = vld [vmem:[%s311_s1 + $0x20] sm:$0xff]  ;;  %v33_v35 = vld [vmem:[%s311_s1 + $0x8] sm:$0xff]  ;;  %v34_v38 = vld [vmem:[%s311_s1 + $0x10] sm:$0xff] }
  0x13   :  { %165 = vmatpush.msra.mxu2 %v49_v12  ;;  %78 = vmatpush.msra.mxu0 %v49_v12  ;;  %v32_v34 = vld [vmem:[%s311_s1] sm:$0xff]  ;;  %v35_v39 = vld [vmem:[%s311_s1 + $0x18] sm:$0xff]  ;;  %s250_s1 = smov [#allocation6]  }
  0x14   :  { %181 = vmatpush.msra.mxu3 %v65_v13  ;;  %107 = vmatpush.msra.mxu1 %v65_v13  ;;  %s144_s9 = sshll.u32 %s250_s1, 4  ;;  %s145_s9 = int_to_ptr.vmem [resolvable:$true] %s144_s9 }
  0x15   :  { %166 = vmatpush.msra.mxu2 %v48_v14  ;;  %79 = vmatpush.msra.mxu0 %v48_v14 }
  0x16   :  { %182 = vmatpush.msra.mxu3 %v64_v15  ;;  %108 = vmatpush.msra.mxu1 %v64_v15 }
  0x17   :  { %167 = vmatpush.msra.mxu2 %v47_v16  ;;  %80 = vmatpush.msra.mxu0 %v47_v16 }
  0x18   :  { %183 = vmatpush.msra.mxu3 %v63_v17  ;;  %109 = vmatpush.msra.mxu1 %v63_v17 }
  0x19   :  { %168 = vmatpush.msra.mxu2 %v46_v18  ;;  %81 = vmatpush.msra.mxu0 %v46_v18 }
  0x1a   :  { %184 = vmatpush.msra.mxu3 %v62_v19  ;;  %110 = vmatpush.msra.mxu1 %v62_v19 }
  0x1b   :  { %169 = vmatpush.msra.mxu2 %v45_v20  ;;  %82 = vmatpush.msra.mxu0 %v45_v20 }
  0x1c   :  { %185 = vmatpush.msra.mxu3 %v61_v21  ;;  %111 = vmatpush.msra.mxu1 %v61_v21 }
  0x1d   :  { %170 = vmatpush.msra.mxu2 %v44_v22  ;;  %83 = vmatpush.msra.mxu0 %v44_v22 }
  0x1e   :  { %186 = vmatpush.msra.mxu3 %v60_v23  ;;  %112 = vmatpush.msra.mxu1 %v60_v23 }
  0x1f   :  { %171 = vmatpush.msra.mxu2 %v43_v24  ;;  %84 = vmatpush.msra.mxu0 %v43_v24 }
  0x20   :  { %187 = vmatpush.msra.mxu3 %v59_v25  ;;  %113 = vmatpush.msra.mxu1 %v59_v25 }
  0x21   :  { %172 = vmatpush.msra.mxu2 %v42_v26  ;;  %85 = vmatpush.msra.mxu0 %v42_v26 }
  0x22   :  { %188 = vmatpush.msra.mxu3 %v58_v27  ;;  %114 = vmatpush.msra.mxu1 %v58_v27 }
  0x23   :  { %173 = vmatpush.msra.mxu2 %v41_v28  ;;  %86 = vmatpush.msra.mxu0 %v41_v28 }
  0x24   :  { %189 = vmatpush.msra.mxu3 %v57_v29  ;;  %115 = vmatpush.msra.mxu1 %v57_v29 }
  0x25   :  { %174 = vmatpush.msra.mxu2 %v40_v30  ;;  %87 = vmatpush.msra.mxu0 %v40_v30 }
  0x26   :  { %190 = vmatpush.msra.mxu3 %v56_v31  ;;  %94 = vmatmul.f32.vlgmr.msra.gmra.mxu2 %v36_v32 }
  0x27   :  { %123 = vmatmul.f32.vlgmr.msra.gmra.mxu3 %v37_v33  ;;  %116 = vmatpush.msra.mxu1 %v56_v31 }
  0x28   :  { %88 = vmatmul.f32.vlgmr.msra.gmra.mxu0 %v32_v34  ;;  %117 = vmatmul.f32.vlgmr.msra.gmra.mxu1 %v33_v35 }
  0x2e   :  { %97 = vmatmul.f32.gmra.mxu2 %v38_v36 }
  0x2f   :  { %126 = vmatmul.f32.gmra.mxu3 %v39_v37 }
  0x30   :  { %91 = vmatmul.f32.gmra.mxu0 %v34_v38  ;;  %120 = vmatmul.f32.gmra.mxu1 %v35_v39 }
  0xa5   :  { %v89_v40 = vpop.f32.mrf.mxu0  ;;  %v118_v41 = vpop.f32.mrf.mxu1 }
  0xa6   :  { %v119_v43 = vadd.f32 %v118_v41, %v89_v40 }
  0xa8   :  { %v132_v44 = vmul.f32 %v131_v42, %v119_v43 }
  0xa9   :  { %v95_v45 = vpop.f32.mrf.mxu2 }
  0xaa   :  { %v124_v46 = vpop.f32.mrf.mxu3  ;;  %136 = vst [vmem:[#allocation6] sm:$0xff] %v132_v44 }
  0xab   :  { %v125_v47 = vadd.f32 %v124_v46, %v95_v45 }
  0xad   :  { %v134_v48 = vmul.f32 %v131_v42, %v125_v47  ;;  %v92_v49 = vpop.f32.mrf.mxu0  ;;  %v121_v50 = vpop.f32.mrf.mxu1 }
  0xae   :  { %v122_v51 = vadd.f32 %v121_v50, %v92_v49 }
  0xaf   :  { %138 = vst [vmem:[#allocation6 + $0x10] sm:$0xff] %v134_v48 }
  0xb0   :  { %v133_v52 = vmul.f32 %v131_v42, %v122_v51 }
  0xb1   :  { %v98_v53 = vpop.f32.mrf.mxu2 }
  0xb2   :  { %v127_v54 = vpop.f32.mrf.mxu3  ;;  %137 = vst [vmem:[#allocation6 + $0x8] sm:$0xff] %v133_v52 }
  0xb3   :  { %v128_v55 = vadd.f32 %v127_v54, %v98_v53 }
  0xb5   :  { %v135_v56 = vmul.f32 %v131_v42, %v128_v55 }
  0xb7   :  { %139 = vst [vmem:[#allocation6 + $0x18] sm:$0xff] %v135_v56 }
  0xb8   :  { %152 = dma.vmem_to_hbm [thread:$0]  %s145_s9, 512, %s147_s0, [#allocation5], %s248_s17, %s248_s17, %s249_s18  }
  0xb9   :  { %245 = dma.done.wait [#allocation5], 512  }
  0xba   :  { %246 = vsyncadd [#allocation5], 4294966784 }
  0xbb   :  { %157 = vsyncpa [#allocation4], 1 }
  0xbc   :  { %158 = vsyncpa [#allocation5], 1 }

</bundles_post_ra>
